<compile_context>
chip_gen: v7x
topology: tpu7x:2x2x1
jax: 0.10.0
libtpu: 0.0.40
codegen_flags: <defaults>
</compile_context>

<pallas_src>
import functools

import jax
import jax.numpy as jnp
from jax.experimental import pallas as pl
from jax.experimental.pallas import tpu as pltpu


_LANE = 128
_SUBLANE = 8
# Per-core VMEM footprint budget (fits v7x 64 MiB physical with headroom) and
# the scoped-VMEM limit requested from Mosaic (above v5e's 16 MiB default).
_VMEM_FOOTPRINT_BUDGET = 40 * 1024 * 1024
_VMEM_LIMIT_BYTES = 48 * 1024 * 1024


def _contrastive_loss_kernel(x0_ref, x1_ref, y_ref, out_ref, acc_ref, *,
                             margin, batch, tile_b, needs_mask,
                             first_masked_tile):
    # x0_ref, x1_ref: (tb, D) VMEM tiles; y_ref: (tb, 1) VMEM tile
    # out_ref: (1, 1) SMEM per-core partial; acc_ref: (tb, 1) f32 VMEM scratch
    c = pl.program_id(0)              # core (parallel axis)
    i = pl.program_id(1)              # per-core step (reduction axis)
    steps = pl.num_programs(1)
    tile = c * steps + i              # logical batch-tile index

    @pl.when(i == 0)
    def _init():
        acc_ref[...] = jnp.zeros_like(acc_ref)

    x0 = x0_ref[...].astype(jnp.float32)
    x1 = x1_ref[...].astype(jnp.float32)
    y = y_ref[...].astype(jnp.float32)                       # (tb, 1)

    diff = x0 - x1                                           # (tb, D)
    dist_sq = jnp.sum(diff * diff, axis=1, keepdims=True)    # (tb, 1)
    dist = jnp.sqrt(dist_sq)                                 # (tb, 1)
    clamped = jnp.maximum(margin - dist, 0.0)                # (tb, 1)
    loss = y * dist_sq + (1.0 - y) * (clamped * clamped)     # (tb, 1)

    if needs_mask:
        # Only the boundary tile / duplicated overflow tiles have padded rows.
        @pl.when(tile >= first_masked_tile)
        def _acc_masked():
            row = tile * tile_b + jax.lax.broadcasted_iota(
                jnp.int32, (tile_b, 1), 0)
            acc_ref[...] += jnp.where(row < batch, loss, 0.0)

        @pl.when(tile < first_masked_tile)
        def _acc_plain():
            acc_ref[...] += loss
    else:
        acc_ref[...] += loss

    @pl.when(i == steps - 1)
    def _finalize():
        out_ref[0, 0] = jnp.sum(acc_ref[...])   # raw per-core partial sum


def _round_down(x, m):
    return (x // m) * m


def _per_row_vmem_bytes(D, x_dtype, y_dtype):
    """VMEM bytes per batch row, counting lane padding and double-buffering."""
    x_isz = jnp.dtype(x_dtype).itemsize
    y_isz = jnp.dtype(y_dtype).itemsize
    d_pad = -(-max(D, 1) // _LANE) * _LANE          # lanes padded to 128
    x_cost = 4 * d_pad * x_isz                      # x0 + x1, double-buffered
    y_cost = 2 * _LANE * y_isz                      # (tb,1) lane-padded, 2 bufs
    acc_cost = _LANE * 4                            # (tb,1) f32 scratch
    return x_cost + y_cost + acc_cost


def _pick_tile_b(B, D, x_dtype, y_dtype):
    per_row = _per_row_vmem_bytes(D, x_dtype, y_dtype)
    tb = _round_down(_VMEM_FOOTPRINT_BUDGET // per_row, _SUBLANE)
    if tb >= B:
        return B                                    # full-dim block is legal
    if tb < _SUBLANE:
        # TODO(synk): add a D-axis grid tile (carried dist_sq) for huge D.
        raise ValueError(
            f"Feature dim D={D} too wide for a single VMEM batch tile "
            f"({per_row} bytes/row vs budget {_VMEM_FOOTPRINT_BUDGET}).")
    return tb


def contrastive_loss(x0, x1, y, margin=1.0, tile_b=None):
    """Pallas-backed equivalent of ContrastiveLoss(margin)(x0, x1, y)."""
    B, D = x0.shape
    y2d = y.reshape(B, 1)
    if not jnp.issubdtype(y2d.dtype, jnp.floating):
        y2d = y2d.astype(jnp.float32)

    if tile_b is None:
        tb = _pick_tile_b(B, D, x0.dtype, y2d.dtype)
    else:
        tb = int(tile_b)
        if tb >= B:
            tb = B                                   # full-dim block
        else:
            tb = max(_SUBLANE, _round_down(tb, _SUBLANE))

    grid_b = pl.cdiv(B, tb)
    num_cores = 2 if grid_b >= 2 else 1   # exploit both TCs on v7x; no-op on 1-TC
    steps = pl.cdiv(grid_b, num_cores)
    total_tiles = num_cores * steps

    if total_tiles > grid_b:
        # Odd tile count: the overflow tile re-reads the last real tile and is
        # fully masked out by its (logical) row indices.
        def tile_index(c, i):
            return jnp.minimum(c * steps + i, grid_b - 1)
    else:
        def tile_index(c, i):
            return c * steps + i

    def x_map(c, i):
        return (tile_index(c, i), 0)

    needs_mask = (total_tiles * tb != B)
    first_masked_tile = grid_b - 1 if (B % tb != 0) else grid_b

    kernel = functools.partial(
        _contrastive_loss_kernel,
        margin=float(margin),
        batch=int(B),
        tile_b=int(tb),
        needs_mask=bool(needs_mask),
        first_masked_tile=int(first_masked_tile),
    )

    bytes_accessed = (x0.size * x0.dtype.itemsize
                      + x1.size * x1.dtype.itemsize
                      + y2d.size * y2d.dtype.itemsize
                      + num_cores * 4)
    cost = pl.CostEstimate(
        flops=4 * B * D + 8 * B,
        transcendentals=B,
        bytes_accessed=bytes_accessed,
    )

    partials = pl.pallas_call(
        kernel,
        out_shape=jax.ShapeDtypeStruct((num_cores, 1), jnp.float32),
        grid_spec=pltpu.PrefetchScalarGridSpec(
            num_scalar_prefetch=0,
            grid=(num_cores, steps),
            in_specs=[
                pl.BlockSpec((tb, D), x_map),
                pl.BlockSpec((tb, D), x_map),
                pl.BlockSpec((tb, 1), x_map),
            ],
            out_specs=pl.BlockSpec((1, 1), lambda c, i: (c, 0),
                                   memory_space=pltpu.SMEM),
            scratch_shapes=[pltpu.VMEM((tb, 1), jnp.float32)],
        ),
        compiler_params=pltpu.CompilerParams(
            dimension_semantics=("parallel", "arbitrary"),
            vmem_limit_bytes=_VMEM_LIMIT_BYTES,
        ),
        cost_estimate=cost,
    )(x0, x1, y2d)

    return jnp.sum(partials) * (1.0 / (2.0 * B))


def _reference(x0, x1, y, margin=1.0):
    # Pure-JAX reference mirroring the PyTorch forward exactly.
    diff = x0 - x1
    dist_sq = jnp.sum(diff ** 2, axis=1)
    dist = jnp.sqrt(dist_sq)
    mdist = margin - dist
    clamped = jnp.maximum(mdist, 0.0)
    loss = y * dist_sq + (1.0 - y) * clamped ** 2
    return jnp.sum(loss) / 2.0 / x0.shape[0]


if __name__ == "__main__":
    key = jax.random.PRNGKey(0)
    k0, k1, k2 = jax.random.split(key, 3)

    # Case 1: small aligned shape -> single tile, single core.
    B, D = 8, 128
    x0 = jax.random.normal(k0, (B, D), dtype=jnp.float32)
    x1 = jax.random.normal(k1, (B, D), dtype=jnp.float32)
    y = jax.random.bernoulli(k2, 0.5, (B,)).astype(jnp.float32)
    loss = contrastive_loss(x0, x1, y, margin=1.0)
    jax.block_until_ready(loss)
    ref = _reference(x0, x1, y, margin=1.0)
    assert jnp.allclose(loss, ref, rtol=1e-5, atol=1e-5), (loss, ref)

    # Case 2: ragged batch + explicit small tile -> 2-core grid, masked tail.
    B2, D2 = 13, 64
    k3, k4, k5 = jax.random.split(k2, 3)
    a0 = jax.random.normal(k3, (B2, D2), dtype=jnp.float32)
    a1 = jax.random.normal(k4, (B2, D2), dtype=jnp.float32)
    yy = jax.random.bernoulli(k5, 0.5, (B2,)).astype(jnp.float32)
    loss2 = contrastive_loss(a0, a1, yy, margin=1.0, tile_b=8)
    jax.block_until_ready(loss2)
    ref2 = _reference(a0, a1, yy, margin=1.0)
    assert jnp.allclose(loss2, ref2, rtol=1e-5, atol=1e-5), (loss2, ref2)

    # Case 3: odd tile count -> clamped duplicated tile on core 1, fully masked.
    B3, D3 = 40, 32
    k6, k7, k8 = jax.random.split(k5, 3)
    b0 = jax.random.normal(k6, (B3, D3), dtype=jnp.float32)
    b1 = jax.random.normal(k7, (B3, D3), dtype=jnp.float32)
    yz = jax.random.bernoulli(k8, 0.5, (B3,)).astype(jnp.float32)
    loss3 = contrastive_loss(b0, b1, yz, margin=1.0, tile_b=16)
    jax.block_until_ready(loss3)
    ref3 = _reference(b0, b1, yz, margin=1.0)
    assert jnp.allclose(loss3, ref3, rtol=1e-5, atol=1e-5), (loss3, ref3)

    print("KERNEL_OK")
</pallas_src>

<mosaic_0001>
module attributes {stable_mosaic.version = 11 : i64} {
  func.func @_contrastive_loss_kernel(%arg0: i32, %arg1: i32, %arg2: memref<8x128xf32, #tpu.memory_space<vmem>>, %arg3: memref<8x128xf32, #tpu.memory_space<vmem>>, %arg4: memref<8x1xf32, #tpu.memory_space<vmem>>, %arg5: memref<1x1xf32, #tpu.memory_space<smem>>, %arg6: memref<8x1xf32, #tpu.memory_space<vmem>>) attributes {dimension_semantics = [#tpu.dimension_semantics<parallel>, #tpu.dimension_semantics<arbitrary>], iteration_bounds = array<i64: 1, 1>, scalar_prefetch = 0 : i64, scratch_operands = 1 : i64, tpu.core_type = #tpu.core_type<tc>, window_params = [{transform_indices = @transform_0, window_bounds = array<i64: 8, 128>}, {transform_indices = @transform_1, window_bounds = array<i64: 8, 128>}, {transform_indices = @transform_2, window_bounds = array<i64: 8, 1>}, {transform_indices = @transform_3, window_bounds = array<i64: 1, 1>}]} {
    %c0_i32 = arith.constant 0 : i32
    %0 = arith.cmpi eq, %arg1, %c0_i32 : i32
    %1 = arith.extui %0 : i1 to i32
    %c0_i32_0 = arith.constant 0 : i32
    %2 = arith.cmpi ne, %1, %c0_i32_0 : i32
    scf.if %2 {
      %cst_15 = arith.constant 0.000000e+00 : f32
      %27 = vector.broadcast %cst_15 : f32 to vector<8x1xf32>
      %c0_16 = arith.constant 0 : index
      %c0_17 = arith.constant 0 : index
      %28 = vector.load %arg6[%c0_16, %c0_17] : memref<8x1xf32, #tpu.memory_space<vmem>>, vector<8x1xf32>
      tpu.vector_store %arg6[%c0_16, %c0_17], %27 {strides = array<i32>} : memref<8x1xf32, #tpu.memory_space<vmem>>, vector<8x1xf32>,
    } else {
    }
    %c0 = arith.constant 0 : index
    %c0_1 = arith.constant 0 : index
    %3 = vector.load %arg2[%c0, %c0_1] : memref<8x128xf32, #tpu.memory_space<vmem>>, vector<8x128xf32>
    %c0_2 = arith.constant 0 : index
    %c0_3 = arith.constant 0 : index
    %4 = vector.load %arg3[%c0_2, %c0_3] : memref<8x128xf32, #tpu.memory_space<vmem>>, vector<8x128xf32>
    %c0_4 = arith.constant 0 : index
    %c0_5 = arith.constant 0 : index
    %5 = vector.load %arg4[%c0_4, %c0_5] : memref<8x1xf32, #tpu.memory_space<vmem>>, vector<8x1xf32>
    %6 = arith.subf %3, %4 : vector<8x128xf32>
    %7 = arith.mulf %6, %6 : vector<8x128xf32>
    %cst = arith.constant dense<0.000000e+00> : vector<8xf32>
    %8 = vector.multi_reduction <add>, %7, %cst [1] : vector<8x128xf32> to vector<8xf32>
    %9 = vector.shape_cast %8 : vector<8xf32> to vector<8x1xf32>
    %10 = math.sqrt %9 : vector<8x1xf32>
    %cst_6 = arith.constant 1.000000e+00 : f32
    %11 = vector.broadcast %cst_6 : f32 to vector<8x1xf32>
    %12 = arith.subf %11, %10 : vector<8x1xf32>
    %cst_7 = arith.constant 0.000000e+00 : f32
    %13 = vector.broadcast %cst_7 : f32 to vector<8x1xf32>
    %14 = arith.maximumf %12, %13 : vector<8x1xf32>
    %15 = arith.mulf %5, %9 : vector<8x1xf32>
    %cst_8 = arith.constant 1.000000e+00 : f32
    %16 = vector.broadcast %cst_8 : f32 to vector<8x1xf32>
    %17 = arith.subf %16, %5 : vector<8x1xf32>
    %18 = arith.mulf %14, %14 : vector<8x1xf32>
    %19 = arith.mulf %17, %18 : vector<8x1xf32>
    %20 = arith.addf %15, %19 : vector<8x1xf32>
    %c0_9 = arith.constant 0 : index
    %c0_10 = arith.constant 0 : index
    %21 = vector.load %arg6[%c0_9, %c0_10] : memref<8x1xf32, #tpu.memory_space<vmem>>, vector<8x1xf32>
    %22 = arith.addf %21, %20 : vector<8x1xf32>
    %c0_11 = arith.constant 0 : index
    %c0_12 = arith.constant 0 : index
    %23 = vector.load %arg6[%c0_11, %c0_12] : memref<8x1xf32, #tpu.memory_space<vmem>>, vector<8x1xf32>
    tpu.vector_store %arg6[%c0_11, %c0_12], %22 {strides = array<i32>} : memref<8x1xf32, #tpu.memory_space<vmem>>, vector<8x1xf32>,
    %c0_i32_13 = arith.constant 0 : i32
    %24 = arith.cmpi eq, %arg1, %c0_i32_13 : i32
    %25 = arith.extui %24 : i1 to i32
    %c0_i32_14 = arith.constant 0 : i32
    %26 = arith.cmpi ne, %25, %c0_i32_14 : i32
    scf.if %26 {
      %c0_15 = arith.constant 0 : index
      %c0_16 = arith.constant 0 : index
      %27 = vector.load %arg6[%c0_15, %c0_16] : memref<8x1xf32, #tpu.memory_space<vmem>>, vector<8x1xf32>
      %28 = vector.shape_cast %27 : vector<8x1xf32> to vector<1x8x1xf32>
      %cst_17 = arith.constant dense<0.000000e+00> : vector<1xf32>
      %29 = vector.multi_reduction <add>, %28, %cst_17 [1, 2] : vector<1x8x1xf32> to vector<1xf32>
      %30 = vector.shape_cast %29 : vector<1xf32> to vector<1x1x1xf32>
      %31 = vector.extract %30[0, 0, 0] : f32 from vector<1x1x1xf32>
      %c0_18 = arith.constant 0 : index
      %c0_19 = arith.constant 0 : index
      %32 = memref.load %arg5[%c0_18, %c0_19] : memref<1x1xf32, #tpu.memory_space<smem>>
      memref.store %31, %arg5[%c0_18, %c0_19] : memref<1x1xf32, #tpu.memory_space<smem>>
    } else {
    }
    return
  }
  func.func @transform_0(%arg0: i32, %arg1: i32) -> (i32, i32) {
    %c1_i32 = arith.constant 1 : i32
    %0 = arith.muli %arg0, %c1_i32 : i32
    %1 = arith.addi %0, %arg1 : i32
    %c0_i32 = arith.constant 0 : i32
    %c0_i32_0 = arith.constant 0 : i32
    return %1, %c0_i32 : i32, i32
  }
  func.func @transform_1(%arg0: i32, %arg1: i32) -> (i32, i32) {
    %c1_i32 = arith.constant 1 : i32
    %0 = arith.muli %arg0, %c1_i32 : i32
    %1 = arith.addi %0, %arg1 : i32
    %c0_i32 = arith.constant 0 : i32
    %c0_i32_0 = arith.constant 0 : i32
    return %1, %c0_i32 : i32, i32
  }
  func.func @transform_2(%arg0: i32, %arg1: i32) -> (i32, i32) {
    %c1_i32 = arith.constant 1 : i32
    %0 = arith.muli %arg0, %c1_i32 : i32
    %1 = arith.addi %0, %arg1 : i32
    %c0_i32 = arith.constant 0 : i32
    %c0_i32_0 = arith.constant 0 : i32
    return %1, %c0_i32 : i32, i32
  }
  func.func @transform_3(%arg0: i32, %arg1: i32) -> (i32, i32) {
    %c0_i32 = arith.constant 0 : i32
    %c0_i32_0 = arith.constant 0 : i32
    return %arg0, %c0_i32 : i32, i32
  }
}

</mosaic_0001>

<bundles_post_ra>
// kernel: tpu_custom_call.1
= control target key start
LH: loop header
LB: loop body
LE: loop exit
PB: predicated region body
PF: predicated region fallthrough
CT: control target
= control target key end

     0   :  { %8 = vsyncpa [#allocation4], 0  ;;  %s237_s0 = inlined_call_operand.vmem [shape: f32[8,128], index: 0, kind: input, shape index: {}]   ;;  %s238_s1 = inlined_call_operand.hbm [shape: f32[8,128], index: 1, kind: input, shape index: {}]   ;;  %s239_s2 = inlined_call_operand.vmem [shape: f32[8,1], index: 2, kind: input, shape index: {}]   ;;  %s240_s3 = inlined_call_operand.hbm [shape: f32[1,1], index: 3, kind: output, shape index: {}]  }
   0x1   :  { %9 = vsyncpa [#allocation5], 0  ;;  %s181_s12 = smov [#allocation3]   ;;  %s145_s16 = scalar_lea.hbm %s238_s1, 128 }
   0x2   :  { %s27_s13 = sshll.u32 %s181_s12, 4  ;;  %p146_p0 = scmp.ne.s32.totalorder %s238_s1, %s145_s16  ;;  %s28_s13 = int_to_ptr.vmem [resolvable:$true] %s27_s13 }
   0x3   :  { %p149_p1 = scmp.lt.u32.totalorder %s145_s16, %s238_s1 }
   0x5   :  { %p151_p2 = pnand %p149_p1, %p146_p0 }
   0x7   :  { %154 = shalt.err (!%p151_p2)
}
   0x8   :  { %s155_s21 = scalar_lea.vmem %s28_s13, 128  ;;  %p160_p4 = scmp.lt.s32.totalorder %s28_s13, %s28_s13 }
   0x9   :  { %p156_p3 = scmp.ne.s32.totalorder %s28_s13, %s155_s21  ;;  %p161_p5 = scmp.lt.s32.totalorder %s155_s21, %s155_s21 }
   0xb   :  { %p162_p6 = por %p161_p5, %p160_p4 }
   0xd   :  { %p163_p7 = pnand %p162_p6, %p156_p3 }
   0xf   :  { %166 = shalt.err (!%p163_p7)
}
  0x10   :  { %30 = dma.hbm_to_vmem [thread:$0]  %s238_s1, 128, %s28_s13, [#allocation4]  }
  0x11   :  { %177 = dma.done.wait [#allocation4], 128  }
  0x12   :  { %178 = vsyncadd [#allocation4], 4294967168  ;;  %v71_v0 = vld [vmem:[%s237_s0] sm:$0xff]  ;;  %v72_v1 = vld [vmem:[#allocation3] sm:$0xff]  ;;  %vm69_vm0 = vcmask 7168   ;;  %v182_v4 = vmov 0.0  }
  0x13   :  { %v74_v2 = vsub.f32 %v71_v0, %v72_v1  ;;  %70 = vst.msk [vmem:[#allocation2] sm:$0xff] %vm69_vm0, %v182_v4  ;;  %v73_v12 = vld [vmem:[%s239_s2] sm:$0xff]  ;;  %s167_s28 = scalar_lea.hbm %s240_s3, 16 }
  0x14   :  { %v88_v13 = vsub.f32 1.0, %v73_v12  ;;  %p168_p8 = scmp.ne.s32.totalorder %s240_s3, %s167_s28  ;;  %p171_p9 = scmp.lt.u32.totalorder %s167_s28, %s240_s3 }
  0x15   :  { %v75_v3 = vmul.f32 %v74_v2, %v74_v2 }
  0x16   :  { %p173_p10 = pnand %p171_p9, %p168_p8 }
  0x17   :  { %76 = vadd.xlane.f32.xlu0 %v75_v3 }
  0x1a   :  { %v92_v18 = vld [vmem:[#allocation2] sm:$0xff] }
  0xa4   :  { %v77_v5 = vpop.xlane.xlu0 %76 }
  0xa5   :  { %143 = vrsqrt.f32 %v77_v5  ;;  %vm80_vm1 = vcmp.eq.f32.partialorder %v77_v5, inf  ;;  %v83_v8 = vand.u32 2147483648, %v77_v5  ;;  %vm82_vm2 = vcmp.eq.f32.partialorder %v77_v5, 0.0 }
  0xa6   :  { %v87_v16 = vmul.f32 %v77_v5, %v73_v12 }
  0xaf   :  { %v144_v6 = vpop.eup %143 }
  0xb0   :  { %v79_v7 = vmul.f32 %v144_v6, %v77_v5 }
  0xb2   :  { %v81_v9 = vsel %vm80_vm1, %v77_v5, %v79_v7 }
  0xb3   :  { %v84_v10 = vsel %vm82_vm2, %v83_v8, %v81_v9 }
  0xb4   :  { %v85_v11 = vsub.f32 1.0, %v84_v10 }
  0xb6   :  { %v86_v14 = vmax.f32 %v85_v11, 0.0 }
  0xb8   :  { %v89_v15 = vmul.f32 %v86_v14, %v86_v14 }
  0xba   :  { %v90_v17 = vmul.f32 %v89_v15, %v88_v13 }
  0xbc   :  { %v91_v19 = vadd.f32 %v90_v17, %v87_v16 }
  0xbe   :  { %v93_v20 = vadd.f32 %v92_v18, %v91_v19 }
  0xc0   :  { %95 = vst.msk [vmem:[#allocation2] sm:$0xff] %vm69_vm0, %v93_v20 }
  0xc7   :  { %v99_v21 = vld [vmem:[#allocation2] sm:$0xff] }
  0xc8   :  { %v100_v22 = vsel %vm69_vm0, %v99_v21, 0.0 }
  0xc9   :  { %101 = vadd.xlane.f32.xlu0 %v100_v22 }
 0x156   :  { %v102_v23 = vpop.xlane.xlu0 %101 }
 0x157   :  { %v103_v24 = vrot.slane %v102_v23, 4 }
 0x159   :  { %v104_v25 = vadd.f32 %v103_v24, %v102_v23 }
 0x15b   :  { %v105_v26 = vrot.slane %v104_v25, 2 }
 0x15d   :  { %v106_v27 = vadd.f32 %v105_v26, %v104_v25 }
 0x15f   :  { %v107_v28 = vrot.slane %v106_v27, 1 }
 0x161   :  { %v108_v29 = vadd.f32 %v107_v28, %v106_v27 }
 0x163   :  { %138 = vpush %v108_v29 }
 0x194   :  { %s139_s2 = spop %138 }
 0x195   :  { %111 = sst [smem:[#allocation6]] %s139_s2 }
 0x196   :  { %176 = shalt.err (!%p173_p10)
}
 0x197   :  { %s183_s6 = smov [#allocation6]  }
 0x198   :  { %119 = dma.smem_to_hbm %s183_s6, 16, %s240_s3, [#allocation5]  }
 0x199   :  { %179 = dma.done.wait [#allocation5], 16  }
 0x19a   :  { %180 = vsyncadd [#allocation5], 4294967280 }
 0x19b   :  { %123 = sfence }
 0x19c   :  { %124 = vsyncpa [#allocation4], 1 }
 0x19d   :  { %125 = vsyncpa [#allocation5], 1 }

</bundles_post_ra>
